<compile_context>
chip_gen: v6e
topology: v6e:2x2x1
jax: 0.10.0
libtpu: 0.0.40
codegen_flags: <defaults>
</compile_context>

<pallas_src>
import functools
import math

import numpy as np
import jax
import jax.numpy as jnp
from jax.experimental import pallas as pl
from jax.experimental.pallas import tpu as pltpu


# ----------------------------- kernel helpers ---------------------------------

def _se_branch(v, w1, b1, k, c, w2, b2):
    """1x1 conv -> ReLU -> BN(eval, folded affine) -> 1x1 conv on a column vector.

    v: (C, 1), w1: (bn2, C), b1/k/c: (bn2, 1), w2: (C, bn2), b2: (C, 1) -> (C, 1)
    """
    h = jnp.dot(w1, v, preferred_element_type=jnp.float32) + b1      # (bn2, 1)
    h = jnp.maximum(h, 0.0)                                          # ReLU
    h = h * k + c                                                    # folded BatchNorm
    return jnp.dot(w2, h, preferred_element_type=jnp.float32) + b2   # (C, 1)


def _scale_from_pools(avg, mx, w1_ref, b1_ref, k_ref, c_ref, w2_ref, b2_ref):
    """avg/mx: (C, 1) pooled column vectors -> sigmoid gate (C, 1), f32."""
    o = (_se_branch(avg, w1_ref[0], b1_ref[0], k_ref[0], c_ref[0], w2_ref[0], b2_ref[0])
         + _se_branch(mx, w1_ref[1], b1_ref[1], k_ref[1], c_ref[1], w2_ref[1], b2_ref[1]))
    return 1.0 / (1.0 + jnp.exp(-o))       # sigmoid (exp goes to the EUP slot)


# ----------------------------- kernels -----------------------------------------

def _fused_kernel(x_ref, w1_ref, b1_ref, k_ref, c_ref, w2_ref, b2_ref, y_ref,
                  *, inv_spatial):
    """Single pass: pool + SE + sigmoid + multiply for one batch row."""
    xf = x_ref[0].astype(jnp.float32)                                # (C, S) widened in-kernel
    avg = jnp.sum(xf, axis=-1, keepdims=True) * inv_spatial          # (C, 1)
    mx = jnp.max(xf, axis=-1, keepdims=True)                         # (C, 1)
    scale = _scale_from_pools(avg, mx, w1_ref, b1_ref, k_ref, c_ref, w2_ref, b2_ref)
    y_ref[0] = (xf * scale).astype(y_ref.dtype)                      # store in native dtype


def _pool_se_kernel(x_ref, w1_ref, b1_ref, k_ref, c_ref, w2_ref, b2_ref,
                    scale_ref, sum_acc, max_acc, *, inv_spatial, spatial, tile, ragged):
    """Pass 1 of the two-pass path: spatial-tiled pooling + SE gate.

    grid = (B, n_spatial_tiles); running sum/max live in VMEM scratch and the
    (C, 1) scale is written once per batch row at the last spatial step.
    A ragged last tile (S % tile != 0) is masked so out-of-bounds lanes never
    contaminate the reduction.
    """
    s = pl.program_id(1)

    @pl.when(s == 0)
    def _():
        sum_acc[...] = jnp.zeros_like(sum_acc)
        max_acc[...] = jnp.full_like(max_acc, -jnp.inf)

    xf = x_ref[0].astype(jnp.float32)                                # (C, ts)
    if ragged:
        lane = jax.lax.broadcasted_iota(jnp.int32, xf.shape, dimension=1)
        valid = (s * tile + lane) < spatial
        x_sum = jnp.where(valid, xf, 0.0)
        x_max = jnp.where(valid, xf, -jnp.inf)
    else:
        x_sum = xf
        x_max = xf
    sum_acc[...] += jnp.sum(x_sum, axis=-1, keepdims=True)
    max_acc[...] = jnp.maximum(max_acc[...], jnp.max(x_max, axis=-1, keepdims=True))

    @pl.when(s == pl.num_programs(1) - 1)
    def _():
        avg = sum_acc[...] * inv_spatial                             # (C, 1)
        scale_ref[0] = _scale_from_pools(avg, max_acc[...],
                                         w1_ref, b1_ref, k_ref, c_ref, w2_ref, b2_ref)


def _apply_scale_kernel(x_ref, scale_ref, y_ref):
    """Pass 2: y = x * scale (per-channel broadcast along the lane/spatial dim)."""
    y_ref[0] = (x_ref[0].astype(jnp.float32) * scale_ref[0]).astype(y_ref.dtype)


# ----------------------------- wrapper ------------------------------------------

def _fold_bn(gamma, beta, rmean, rvar, eps):
    k = gamma / jnp.sqrt(rvar + eps)
    return k, beta - rmean * k


def _vmem_limit_bytes():
    """Per-generation scoped-VMEM limit (128 MiB v5e/v6e, 64 MiB v7x physical)."""
    cap = 64 << 20                         # conservative fallback (safe on every gen)
    try:
        cap = int(pltpu.get_tpu_info().vmem_capacity_bytes)
    except Exception:
        pass
    # leave headroom for compiler-internal scratch; never below the default scoped limit
    return max(32 << 20, min((cap * 3) // 4, 112 << 20))


def _pick_spatial_tile(C, S, budget_bytes):
    """Largest lane-aligned (multiple-of-128) spatial tile whose (C, ts) f32 block
    fits the budget.  A ragged tail is allowed (masked in the pool kernel)."""
    if C * S * 4 <= budget_bytes or S <= 128:
        return S
    ts = max(128, (budget_bytes // (C * 4)) // 128 * 128)
    ts = min(ts, (S // 128) * 128)
    # Prefer an exact divisor of S (no masked tail) if one is reasonably close.
    for cand in range(ts, max(128, ts - 8 * 128) - 1, -128):
        if S % cand == 0:
            return cand
    return ts


def channel_attention_forward(x, params, *, spatial_tile=None, force_two_pass=False):
    """Pallas implementation of ChannelAttention.forward (eval-mode BatchNorm).

    Output dtype matches x.dtype; all reductions / the SE gate run in float32.
    """
    B, C, L, T = x.shape
    S = L * T
    x3 = x.reshape(B, C, S)                          # native dtype, free reshape
    out_dtype = x.dtype
    eps = params.get("eps", 1e-5)

    # Fold BN(eval) into a per-channel affine, stack the two SE branches on a
    # leading axis of size 2 (index 0 = avg branch, 1 = max branch).
    k_a, c_a = _fold_bn(params["bn_gamma_avg"], params["bn_beta_avg"],
                        params["bn_mean_avg"], params["bn_var_avg"], eps)
    k_m, c_m = _fold_bn(params["bn_gamma_max"], params["bn_beta_max"],
                        params["bn_mean_max"], params["bn_var_max"], eps)

    w1 = jnp.stack([params["w1_avg"], params["w1_max"]]).astype(jnp.float32)      # (2,bn2,C)
    b1 = jnp.stack([params["b1_avg"], params["b1_max"]])[..., None].astype(jnp.float32)
    kk = jnp.stack([k_a, k_m])[..., None].astype(jnp.float32)                     # (2,bn2,1)
    cc = jnp.stack([c_a, c_m])[..., None].astype(jnp.float32)
    w2 = jnp.stack([params["w2_avg"], params["w2_max"]]).astype(jnp.float32)      # (2,C,bn2)
    b2 = jnp.stack([params["b2_avg"], params["b2_max"]])[..., None].astype(jnp.float32)
    param_arrays = (w1, b1, kk, cc, w2, b2)

    vmem_limit = _vmem_limit_bytes()

    def _resident_spec(a, grid_ndim):
        shp = a.shape
        if grid_ndim == 1:
            return pl.BlockSpec(shp, lambda b: (0,) * len(shp))
        return pl.BlockSpec(shp, lambda b, s: (0,) * len(shp))

    def _cparams(sem):
        return pltpu.CompilerParams(dimension_semantics=sem,
                                    vmem_limit_bytes=vmem_limit)

    # Fused VMEM cost (f32-equivalent): double-buffered in + out blocks plus
    # elementwise f32 temporaries ~ 6-8x the (C, S) block.  Fused path does
    # 1 HBM read + 1 write per element vs two-pass 2 reads + 1 write.
    row_f32_bytes = C * S * 4
    use_fused = (not force_two_pass) and (8 * row_f32_bytes <= vmem_limit)

    if use_fused:
        y3 = pl.pallas_call(
            functools.partial(_fused_kernel, inv_spatial=1.0 / S),
            out_shape=jax.ShapeDtypeStruct((B, C, S), out_dtype),
            grid=(B,),
            in_specs=[pl.BlockSpec((1, C, S), lambda b: (b, 0, 0))]
                     + [_resident_spec(a, 1) for a in param_arrays],
            out_specs=pl.BlockSpec((1, C, S), lambda b: (b, 0, 0)),
            compiler_params=_cparams(("parallel",)),
        )(x3, *param_arrays)
        return y3.reshape(B, C, L, T)

    # ---- two-pass path (large C*S): tiled reduction then tiled multiply ----
    if spatial_tile is None:
        ts = _pick_spatial_tile(C, S, budget_bytes=vmem_limit // 8)
    else:
        ts = spatial_tile
        assert ts == S or ts % 128 == 0, "spatial tile must be S or a multiple of 128"
    n_s = pl.cdiv(S, ts)
    ragged = (S % ts) != 0

    scale = pl.pallas_call(
        functools.partial(_pool_se_kernel, inv_spatial=1.0 / S,
                          spatial=S, tile=ts, ragged=ragged),
        out_shape=jax.ShapeDtypeStruct((B, C, 1), jnp.float32),
        grid=(B, n_s),
        in_specs=[pl.BlockSpec((1, C, ts), lambda b, s: (b, 0, s))]
                 + [_resident_spec(a, 2) for a in param_arrays],
        out_specs=pl.BlockSpec((1, C, 1), lambda b, s: (b, 0, 0)),
        scratch_shapes=[pltpu.VMEM((C, 1), jnp.float32),     # running sum
                        pltpu.VMEM((C, 1), jnp.float32)],    # running max
        compiler_params=_cparams(("parallel", "arbitrary")),
    )(x3, *param_arrays)

    y3 = pl.pallas_call(
        _apply_scale_kernel,
        out_shape=jax.ShapeDtypeStruct((B, C, S), out_dtype),
        grid=(B, n_s),
        in_specs=[pl.BlockSpec((1, C, ts), lambda b, s: (b, 0, s)),
                  pl.BlockSpec((1, C, 1), lambda b, s: (b, 0, 0))],
        out_specs=pl.BlockSpec((1, C, ts), lambda b, s: (b, 0, s)),
        compiler_params=_cparams(("parallel", "parallel")),
    )(x3, scale)
    return y3.reshape(B, C, L, T)


# ----------------------------- pure-JAX reference --------------------------------

def reference_forward(x, params):
    """Replica of ChannelAttention.forward (eval-mode BatchNorm) in plain JAX."""
    eps = params.get("eps", 1e-5)
    avg = jnp.mean(x, axis=(2, 3))        # AdaptiveAvgPool2d((1,1)) -> (B, C)
    mx = jnp.max(x, axis=(2, 3))          # AdaptiveMaxPool2d((1,1)) -> (B, C)

    def branch(v, w1, b1, g, be, rm, rv, w2, b2):
        h = v @ w1.T + b1                 # 1x1 conv
        h = jnp.maximum(h, 0.0)           # ReLU
        h = (h - rm) / jnp.sqrt(rv + eps) * g + be   # BatchNorm2d (eval)
        return h @ w2.T + b2              # 1x1 conv

    oa = branch(avg, params["w1_avg"], params["b1_avg"], params["bn_gamma_avg"],
                params["bn_beta_avg"], params["bn_mean_avg"], params["bn_var_avg"],
                params["w2_avg"], params["b2_avg"])
    om = branch(mx, params["w1_max"], params["b1_max"], params["bn_gamma_max"],
                params["bn_beta_max"], params["bn_mean_max"], params["bn_var_max"],
                params["w2_max"], params["b2_max"])
    scale = jax.nn.sigmoid(oa + om)       # (B, C)
    return x * scale[:, :, None, None]


# ----------------------------- test ----------------------------------------------

if __name__ == "__main__":
    B, in_dim, L, T = 2, 4, 16, 16
    bottleneck = 8
    bn2 = bottleneck // 2

    key = jax.random.PRNGKey(0)
    ks = jax.random.split(key, 14)

    x = jax.random.normal(ks[0], (B, in_dim, L, T), dtype=jnp.float32)

    kai_bound = math.sqrt(6.0 / in_dim)                 # kaiming_uniform bound (relu)
    xav_bound = math.sqrt(6.0 / (bn2 + in_dim))         # xavier_uniform bound

    params = {
        # avg branch
        "w1_avg": jax.random.uniform(ks[1], (bn2, in_dim), minval=-kai_bound, maxval=kai_bound),
        "b1_avg": jnp.zeros((bn2,), jnp.float32),
        "bn_gamma_avg": jax.random.uniform(ks[2], (bn2,), minval=0.5, maxval=1.5),
        "bn_beta_avg": 0.1 * jax.random.normal(ks[3], (bn2,)),
        "bn_mean_avg": 0.1 * jax.random.normal(ks[4], (bn2,)),
        "bn_var_avg": jax.random.uniform(ks[5], (bn2,), minval=0.5, maxval=1.5),
        "w2_avg": jax.random.uniform(ks[6], (in_dim, bn2), minval=-xav_bound, maxval=xav_bound),
        "b2_avg": jnp.zeros((in_dim,), jnp.float32),
        # max branch (distinct keys from the avg branch)
        "w1_max": jax.random.uniform(ks[7], (bn2, in_dim), minval=-kai_bound, maxval=kai_bound),
        "b1_max": jnp.zeros((bn2,), jnp.float32),
        "bn_gamma_max": jax.random.uniform(ks[8], (bn2,), minval=0.5, maxval=1.5),
        "bn_beta_max": 0.1 * jax.random.normal(ks[9], (bn2,)),
        "bn_mean_max": 0.1 * jax.random.normal(ks[10], (bn2,)),
        "bn_var_max": jax.random.uniform(ks[11], (bn2,), minval=0.5, maxval=1.5),
        "w2_max": jax.random.uniform(ks[12], (in_dim, bn2), minval=-xav_bound, maxval=xav_bound),
        "b2_max": jnp.zeros((in_dim,), jnp.float32),
        "eps": 1e-5,
    }

    # Fused single-pass kernel (small rows fit VMEM).
    y_fused = jax.block_until_ready(channel_attention_forward(x, params))

    # Two-pass tiled path (exercise the spatial-reduction accumulator).
    y_two = jax.block_until_ready(
        channel_attention_forward(x, params, force_two_pass=True, spatial_tile=128))

    y_ref = reference_forward(x, params)
    np.testing.assert_allclose(np.asarray(y_fused), np.asarray(y_ref), rtol=1e-5, atol=1e-5)
    np.testing.assert_allclose(np.asarray(y_two), np.asarray(y_ref), rtol=1e-5, atol=1e-5)

    # Native bf16 I/O path: input stays bf16 end-to-end, output dtype follows input.
    x_bf16 = x.astype(jnp.bfloat16)
    y_bf16 = jax.block_until_ready(channel_attention_forward(x_bf16, params))
    assert y_bf16.dtype == jnp.bfloat16
    y_ref_bf16 = reference_forward(x_bf16.astype(jnp.float32), params)
    np.testing.assert_allclose(np.asarray(y_bf16, dtype=np.float32),
                               np.asarray(y_ref_bf16), rtol=2e-2, atol=2e-2)

    # Ragged spatial size (S not a multiple of the tile): masked last tile in pass 1.
    x_rag = jax.random.normal(ks[13], (B, in_dim, 16, 17), dtype=jnp.float32)
    y_rag = jax.block_until_ready(
        channel_attention_forward(x_rag, params, force_two_pass=True, spatial_tile=128))
    y_rag_ref = reference_forward(x_rag, params)
    np.testing.assert_allclose(np.asarray(y_rag), np.asarray(y_rag_ref), rtol=1e-5, atol=1e-5)

    print("KERNEL_OK")
</pallas_src>

<mosaic_0001>
module attributes {stable_mosaic.version = 11 : i64} {
  func.func @_fused_kernel(%arg0: i32, %arg1: memref<1x4x256xf32, #tpu.memory_space<vmem>>, %arg2: memref<2x4x4xf32, #tpu.memory_space<vmem>>, %arg3: memref<2x4x1xf32, #tpu.memory_space<vmem>>, %arg4: memref<2x4x1xf32, #tpu.memory_space<vmem>>, %arg5: memref<2x4x1xf32, #tpu.memory_space<vmem>>, %arg6: memref<2x4x4xf32, #tpu.memory_space<vmem>>, %arg7: memref<2x4x1xf32, #tpu.memory_space<vmem>>, %arg8: memref<1x4x256xf32, #tpu.memory_space<vmem>>) attributes {dimension_semantics = [#tpu.dimension_semantics<parallel>], iteration_bounds = array<i64: 2>, scalar_prefetch = 0 : i64, scratch_operands = 0 : i64, tpu.core_type = #tpu.core_type<tc>, window_params = [{transform_indices = @transform_0, window_bounds = array<i64: 1, 4, 256>}, {pipeline_mode = #tpu.pipeline_mode<synchronous>, transform_indices = @transform_1, window_bounds = array<i64: 2, 4, 4>}, {pipeline_mode = #tpu.pipeline_mode<synchronous>, transform_indices = @transform_2, window_bounds = array<i64: 2, 4, 1>}, {pipeline_mode = #tpu.pipeline_mode<synchronous>, transform_indices = @transform_3, window_bounds = array<i64: 2, 4, 1>}, {pipeline_mode = #tpu.pipeline_mode<synchronous>, transform_indices = @transform_4, window_bounds = array<i64: 2, 4, 1>}, {pipeline_mode = #tpu.pipeline_mode<synchronous>, transform_indices = @transform_5, window_bounds = array<i64: 2, 4, 4>}, {pipeline_mode = #tpu.pipeline_mode<synchronous>, transform_indices = @transform_6, window_bounds = array<i64: 2, 4, 1>}, {transform_indices = @transform_7, window_bounds = array<i64: 1, 4, 256>}]} {
    %c0 = arith.constant 0 : index
    %c0_0 = arith.constant 0 : index
    %c0_1 = arith.constant 0 : index
    %0 = vector.load %arg1[%c0, %c0_0, %c0_1] : memref<1x4x256xf32, #tpu.memory_space<vmem>>, vector<1x4x256xf32>
    %1 = vector.shape_cast %0 : vector<1x4x256xf32> to vector<4x256xf32>
    %cst = arith.constant dense<0.000000e+00> : vector<4xf32>
    %2 = vector.multi_reduction <add>, %1, %cst [1] : vector<4x256xf32> to vector<4xf32>
    %3 = vector.shape_cast %2 : vector<4xf32> to vector<4x1xf32>
    %cst_2 = arith.constant 3.906250e-03 : f32
    %4 = vector.broadcast %cst_2 : f32 to vector<4x1xf32>
    %5 = arith.mulf %3, %4 : vector<4x1xf32>
    %cst_3 = arith.constant dense<0xFF800000> : vector<4xf32>
    %6 = vector.multi_reduction <maximumf>, %1, %cst_3 [1] : vector<4x256xf32> to vector<4xf32>
    %7 = vector.shape_cast %6 : vector<4xf32> to vector<4x1xf32>
    %c0_4 = arith.constant 0 : index
    %c0_5 = arith.constant 0 : index
    %c0_6 = arith.constant 0 : index
    %8 = vector.load %arg2[%c0_4, %c0_5, %c0_6] : memref<2x4x4xf32, #tpu.memory_space<vmem>>, vector<1x4x4xf32>
    %9 = vector.shape_cast %8 : vector<1x4x4xf32> to vector<4x4xf32>
    %c0_7 = arith.constant 0 : index
    %c0_8 = arith.constant 0 : index
    %c0_9 = arith.constant 0 : index
    %10 = vector.load %arg3[%c0_7, %c0_8, %c0_9] : memref<2x4x1xf32, #tpu.memory_space<vmem>>, vector<1x4x1xf32>
    %11 = vector.shape_cast %10 : vector<1x4x1xf32> to vector<4x1xf32>
    %c0_10 = arith.constant 0 : index
    %c0_11 = arith.constant 0 : index
    %c0_12 = arith.constant 0 : index
    %12 = vector.load %arg4[%c0_10, %c0_11, %c0_12] : memref<2x4x1xf32, #tpu.memory_space<vmem>>, vector<1x4x1xf32>
    %13 = vector.shape_cast %12 : vector<1x4x1xf32> to vector<4x1xf32>
    %c0_13 = arith.constant 0 : index
    %c0_14 = arith.constant 0 : index
    %c0_15 = arith.constant 0 : index
    %14 = vector.load %arg5[%c0_13, %c0_14, %c0_15] : memref<2x4x1xf32, #tpu.memory_space<vmem>>, vector<1x4x1xf32>
    %15 = vector.shape_cast %14 : vector<1x4x1xf32> to vector<4x1xf32>
    %c0_16 = arith.constant 0 : index
    %c0_17 = arith.constant 0 : index
    %c0_18 = arith.constant 0 : index
    %16 = vector.load %arg6[%c0_16, %c0_17, %c0_18] : memref<2x4x4xf32, #tpu.memory_space<vmem>>, vector<1x4x4xf32>
    %17 = vector.shape_cast %16 : vector<1x4x4xf32> to vector<4x4xf32>
    %c0_19 = arith.constant 0 : index
    %c0_20 = arith.constant 0 : index
    %c0_21 = arith.constant 0 : index
    %18 = vector.load %arg7[%c0_19, %c0_20, %c0_21] : memref<2x4x1xf32, #tpu.memory_space<vmem>>, vector<1x4x1xf32>
    %19 = vector.shape_cast %18 : vector<1x4x1xf32> to vector<4x1xf32>
    %cst_22 = arith.constant dense<0.000000e+00> : vector<4x1xf32>
    %20 = tpu.matmul %9, %5, %cst_22 {dimension_numbers = #tpu.dot_dimension_numbers<[1], [0], [0], [1], [0, 0, 1, 1], [], []>} : vector<4x4xf32>, vector<4x1xf32>, vector<4x1xf32> -> vector<4x1xf32>
    %21 = arith.addf %20, %11 : vector<4x1xf32>
    %cst_23 = arith.constant 0.000000e+00 : f32
    %22 = vector.broadcast %cst_23 : f32 to vector<4x1xf32>
    %23 = arith.maximumf %21, %22 : vector<4x1xf32>
    %24 = arith.mulf %23, %13 : vector<4x1xf32>
    %25 = arith.addf %24, %15 : vector<4x1xf32>
    %cst_24 = arith.constant dense<0.000000e+00> : vector<4x1xf32>
    %26 = tpu.matmul %17, %25, %cst_24 {dimension_numbers = #tpu.dot_dimension_numbers<[1], [0], [0], [1], [0, 0, 1, 1], [], []>} : vector<4x4xf32>, vector<4x1xf32>, vector<4x1xf32> -> vector<4x1xf32>
    %27 = arith.addf %26, %19 : vector<4x1xf32>
    %c1 = arith.constant 1 : index
    %c0_25 = arith.constant 0 : index
    %c0_26 = arith.constant 0 : index
    %28 = vector.load %arg2[%c1, %c0_25, %c0_26] : memref<2x4x4xf32, #tpu.memory_space<vmem>>, vector<1x4x4xf32>
    %29 = vector.shape_cast %28 : vector<1x4x4xf32> to vector<4x4xf32>
    %c1_27 = arith.constant 1 : index
    %c0_28 = arith.constant 0 : index
    %c0_29 = arith.constant 0 : index
    %30 = vector.load %arg3[%c1_27, %c0_28, %c0_29] : memref<2x4x1xf32, #tpu.memory_space<vmem>>, vector<1x4x1xf32>
    %31 = vector.shape_cast %30 : vector<1x4x1xf32> to vector<4x1xf32>
    %c1_30 = arith.constant 1 : index
    %c0_31 = arith.constant 0 : index
    %c0_32 = arith.constant 0 : index
    %32 = vector.load %arg4[%c1_30, %c0_31, %c0_32] : memref<2x4x1xf32, #tpu.memory_space<vmem>>, vector<1x4x1xf32>
    %33 = vector.shape_cast %32 : vector<1x4x1xf32> to vector<4x1xf32>
    %c1_33 = arith.constant 1 : index
    %c0_34 = arith.constant 0 : index
    %c0_35 = arith.constant 0 : index
    %34 = vector.load %arg5[%c1_33, %c0_34, %c0_35] : memref<2x4x1xf32, #tpu.memory_space<vmem>>, vector<1x4x1xf32>
    %35 = vector.shape_cast %34 : vector<1x4x1xf32> to vector<4x1xf32>
    %c1_36 = arith.constant 1 : index
    %c0_37 = arith.constant 0 : index
    %c0_38 = arith.constant 0 : index
    %36 = vector.load %arg6[%c1_36, %c0_37, %c0_38] : memref<2x4x4xf32, #tpu.memory_space<vmem>>, vector<1x4x4xf32>
    %37 = vector.shape_cast %36 : vector<1x4x4xf32> to vector<4x4xf32>
    %c1_39 = arith.constant 1 : index
    %c0_40 = arith.constant 0 : index
    %c0_41 = arith.constant 0 : index
    %38 = vector.load %arg7[%c1_39, %c0_40, %c0_41] : memref<2x4x1xf32, #tpu.memory_space<vmem>>, vector<1x4x1xf32>
    %39 = vector.shape_cast %38 : vector<1x4x1xf32> to vector<4x1xf32>
    %cst_42 = arith.constant dense<0.000000e+00> : vector<4x1xf32>
    %40 = tpu.matmul %29, %7, %cst_42 {dimension_numbers = #tpu.dot_dimension_numbers<[1], [0], [0], [1], [0, 0, 1, 1], [], []>} : vector<4x4xf32>, vector<4x1xf32>, vector<4x1xf32> -> vector<4x1xf32>
    %41 = arith.addf %40, %31 : vector<4x1xf32>
    %cst_43 = arith.constant 0.000000e+00 : f32
    %42 = vector.broadcast %cst_43 : f32 to vector<4x1xf32>
    %43 = arith.maximumf %41, %42 : vector<4x1xf32>
    %44 = arith.mulf %43, %33 : vector<4x1xf32>
    %45 = arith.addf %44, %35 : vector<4x1xf32>
    %cst_44 = arith.constant dense<0.000000e+00> : vector<4x1xf32>
    %46 = tpu.matmul %37, %45, %cst_44 {dimension_numbers = #tpu.dot_dimension_numbers<[1], [0], [0], [1], [0, 0, 1, 1], [], []>} : vector<4x4xf32>, vector<4x1xf32>, vector<4x1xf32> -> vector<4x1xf32>
    %47 = arith.addf %46, %39 : vector<4x1xf32>
    %48 = arith.addf %27, %47 : vector<4x1xf32>
    %cst_45 = arith.constant 0.000000e+00 : f32
    %49 = vector.broadcast %cst_45 : f32 to vector<4x1xf32>
    %50 = arith.subf %49, %48 : vector<4x1xf32>
    %51 = math.exp %50 : vector<4x1xf32>
    %cst_46 = arith.constant 1.000000e+00 : f32
    %52 = vector.broadcast %cst_46 : f32 to vector<4x1xf32>
    %53 = arith.addf %52, %51 : vector<4x1xf32>
    %cst_47 = arith.constant 1.000000e+00 : f32
    %54 = vector.broadcast %cst_47 : f32 to vector<4x1xf32>
    %55 = arith.divf %54, %53 : vector<4x1xf32>
    %56 = vector.broadcast %55 : vector<4x1xf32> to vector<4x256xf32>
    %57 = arith.mulf %1, %56 : vector<4x256xf32>
    %c0_48 = arith.constant 0 : index
    %c0_49 = arith.constant 0 : index
    %c0_50 = arith.constant 0 : index
    %58 = vector.load %arg8[%c0_48, %c0_49, %c0_50] : memref<1x4x256xf32, #tpu.memory_space<vmem>>, vector<1x4x256xf32>
    %59 = vector.shape_cast %58 : vector<1x4x256xf32> to vector<4x256xf32>
    %60 = vector.shape_cast %57 : vector<4x256xf32> to vector<1x4x256xf32>
    tpu.vector_store %arg8[%c0_48, %c0_49, %c0_50], %60 {strides = array<i32>} : memref<1x4x256xf32, #tpu.memory_space<vmem>>, vector<1x4x256xf32>,
    return
  }
  func.func @transform_0(%arg0: i32) -> (i32, i32, i32) {
    %c0_i32 = arith.constant 0 : i32
    %c0_i32_0 = arith.constant 0 : i32
    %c0_i32_1 = arith.constant 0 : i32
    return %arg0, %c0_i32, %c0_i32_0 : i32, i32, i32
  }
  func.func @transform_1(%arg0: i32) -> (i32, i32, i32) {
    %c0_i32 = arith.constant 0 : i32
    %c0_i32_0 = arith.constant 0 : i32
    %c0_i32_1 = arith.constant 0 : i32
    %c0_i32_2 = arith.constant 0 : i32
    return %c0_i32, %c0_i32_0, %c0_i32_1 : i32, i32, i32
  }
  func.func @transform_2(%arg0: i32) -> (i32, i32, i32) {
    %c0_i32 = arith.constant 0 : i32
    %c0_i32_0 = arith.constant 0 : i32
    %c0_i32_1 = arith.constant 0 : i32
    %c0_i32_2 = arith.constant 0 : i32
    return %c0_i32, %c0_i32_0, %c0_i32_1 : i32, i32, i32
  }
  func.func @transform_3(%arg0: i32) -> (i32, i32, i32) {
    %c0_i32 = arith.constant 0 : i32
    %c0_i32_0 = arith.constant 0 : i32
    %c0_i32_1 = arith.constant 0 : i32
    %c0_i32_2 = arith.constant 0 : i32
    return %c0_i32, %c0_i32_0, %c0_i32_1 : i32, i32, i32
  }
  func.func @transform_4(%arg0: i32) -> (i32, i32, i32) {
    %c0_i32 = arith.constant 0 : i32
    %c0_i32_0 = arith.constant 0 : i32
    %c0_i32_1 = arith.constant 0 : i32
    %c0_i32_2 = arith.constant 0 : i32
    return %c0_i32, %c0_i32_0, %c0_i32_1 : i32, i32, i32
  }
  func.func @transform_5(%arg0: i32) -> (i32, i32, i32) {
    %c0_i32 = arith.constant 0 : i32
    %c0_i32_0 = arith.constant 0 : i32
    %c0_i32_1 = arith.constant 0 : i32
    %c0_i32_2 = arith.constant 0 : i32
    return %c0_i32, %c0_i32_0, %c0_i32_1 : i32, i32, i32
  }
  func.func @transform_6(%arg0: i32) -> (i32, i32, i32) {
    %c0_i32 = arith.constant 0 : i32
    %c0_i32_0 = arith.constant 0 : i32
    %c0_i32_1 = arith.constant 0 : i32
    %c0_i32_2 = arith.constant 0 : i32
    return %c0_i32, %c0_i32_0, %c0_i32_1 : i32, i32, i32
  }
  func.func @transform_7(%arg0: i32) -> (i32, i32, i32) {
    %c0_i32 = arith.constant 0 : i32
    %c0_i32_0 = arith.constant 0 : i32
    %c0_i32_1 = arith.constant 0 : i32
    return %arg0, %c0_i32, %c0_i32_0 : i32, i32, i32
  }
}

</mosaic_0001>

<bundles_post_ra>
// kernel: tpu_custom_call.1
= control target key start
LH: loop header
LB: loop body
LE: loop exit
PB: predicated region body
PF: predicated region fallthrough
CT: control target
= control target key end

     0   :  { %12 = vsyncpa [#allocation3], 0  ;;  %s1076_s0 = inlined_call_operand.vmem [shape: f32[2,4,256], index: 0, kind: input, shape index: {}]   ;;  %s1077_s1 = inlined_call_operand.vmem [shape: f32[2,4,4], index: 1, kind: input, shape index: {}]   ;;  %s1078_s2 = inlined_call_operand.vmem [shape: f32[2,4,1], index: 2, kind: input, shape index: {}]   ;;  %s1079_s3 = inlined_call_operand.vmem [shape: f32[2,4,1], index: 3, kind: input, shape index: {}]   ;;  %s1080_s4 = inlined_call_operand.vmem [shape: f32[2,4,1], index: 4, kind: input, shape index: {}]   ;;  %s1081_s5 = inlined_call_operand.vmem [shape: f32[2,4,4], index: 5, kind: input, shape index: {}]   ;;  %s1082_s6 = inlined_call_operand.vmem [shape: f32[2,4,1], index: 6, kind: input, shape index: {}]   ;;  %s1083_s7 = inlined_call_operand.hbm [shape: f32[2,4,256], index: 7, kind: output, shape index: {}]  }
   0x1   :  { %14 = vsyncpa [#allocation3 + $0x1], 0  ;;  %s930_s24 = smov 0   ;;  %s932_s25 = smov 0  }
   0x2   :  { %s934_s26 = smov 0   ;;  %s936_s27 = smov 0  }
   0x3 LB: > { %s951_s28 = sadd.s32 4294967295, %s883_s27   ;;  %s717_s29 = sadd.s32 4294967294, %s883_s27   ;;  %s883_s27 = sphi %s936_s27, %s1089_s27   ;;  %s879_s26 = sphi %s934_s26, %s1088_s26   ;;  %s875_s25 = sphi %s932_s25, %s1087_s25   ;;  %s871_s24 = sphi %s930_s24, %s1086_s24  }
   0x4   : > { %s955_s30 = sadd.s32 1, %s883_s27   ;;  %s179_s8 = sadd.s32 1, %s879_s26 }
   0x5   : > { %s176_s9 = ssub.s32 %s883_s27, %s955_s30  ;;  %p189_p0 = scmp.ne.s32.totalorder %s879_s26, %s875_s25 }
   0x6   : > { %p177_p1 = scmp.eq.s32.totalorder %s176_s9, 0  ;;  %p190_p2 = scmp.eq.s32.totalorder %s951_s28, 1 }
   0x7   : > { %p195_p3 = scmp.ne.s32.totalorder %s875_s25, %s871_s24  ;;  %p196_p4 = scmp.eq.s32.totalorder %s717_s29, 1 }
   0x8   : > { %s966_s10 = scalar_select %p177_p1, %s879_s26, %s179_s8  }
   0x9   : > { %p968_p5 = por %p190_p2, %p189_p0  ;;  %p972_p6 = por %p196_p4, %p195_p3 }
   0xa   : > { %p720_p7 = scmp.ge.s32.totalorder %s883_s27, 1  ;;  %p240_p8 = scmp.lt.s32.totalorder %s883_s27, 3 }
   0xc   : > { %p241_p9 = pnand %p720_p7, %p240_p8 }
   0xd   : > { %p272_p10 = scmp.lt.s32.totalorder (!%p241_p9), %s951_s28, 1  ;;  %s744_s16 = sshll.u32 (!%p241_p9), %s951_s28, 7 }
   0xe   : > { %244 = sbr.rel (%p241_p9) target bundleno = 748 (0x2ec), region = 48  ;;  %s656_s21 = scalar_lea.hbm (!%p241_p9), %s1083_s7, %s744_s16 }
   0xf   : > { %s889_s29 = smov (!%p241_p9), [#allocation2]  }
  0x10   : > { %s827_s8 = sshll.u32 (!%p241_p9), %s889_s29, 4  ;;  %s828_s8 = int_to_ptr.vmem [resolvable:$false] %s827_s8 }
  0x13   : > { %s273_s13 = scalar_select %p272_p10, %s951_s28, 1  ;;  %vm281_vm0 = vcmask 1043456   ;;  %v885_v8 = vmov 0.0   ;;  %vm886_vm1 = vmmov 0   ;;  %v293_v11 = vld [vmem:[%s1077_s1] sm:$0xf]  ;;  %v636_v51 = vlaneseq }
  0x14   : > { %753 = vmatprep.subr.mxu0 %v885_v8  ;;  %758 = vmatprep.subr.mxu1 %v885_v8  ;;  %vm299_vm2 = vcmask 31744   ;;  %v728_v13 = vld [vmem:[%s1077_s1 + $0x4] sm:$0xf]  ;;  %v294_v14 = vld [vmem:[%s1078_s2] sm:$0xf]  ;;  %v887_v34 = vmov 0  }
  0x15   : > { %s743_s14 = sshll.u32 %s273_s13, 3  ;;  %755 = vmatprep.mubr.msk.f32.mxu0 %vm886_vm1, %v885_v8  ;;  %760 = vmatprep.mubr.msk.f32.mxu1 %vm886_vm1, %v885_v8  ;;  %v295_v17 = vld [vmem:[%s1079_s3] sm:$0xf]  ;;  %v729_v19 = vld [vmem:[%s1078_s2 + $0x4] sm:$0xf]  ;;  %v637_v53 = vshrl.u32 %v636_v51, 7 }
  0x16   : > { %s276_s17 = scalar_lea.vmem %s1076_s0, %s743_s14  ;;  %v296_v22 = vld [vmem:[%s1080_s4] sm:$0xf]  ;;  %v730_v25 = vld [vmem:[%s1079_s3 + $0x4] sm:$0xf]  ;;  %816 = vset.pattern.permute.xlu1 %v887_v34  ;;  %817 = vset.pattern.permute.xlu0 %v887_v34  ;;  %v888_v49 = vmov 839922192  }
  0x17   : > { %v983_v0 = vld [vmem:[%s276_s17] sm:$0xff]  ;;  %v634_v50 = vunpack.c.l.s4 %v888_v49  ;;  %s269_s14 = sand.u32 1, %s875_s25   ;;  %s829_s28 = scalar_lea.vmem %s828_s8, 256 }
  0x18   : > { %v279_v1 = vcombine.high %v983_v0, %v983_v0  ;;  %v282_v2 = vsel %vm281_vm0, %v983_v0, 0.0  ;;  %v288_v4 = vsel %vm281_vm0, %v983_v0, -inf  ;;  %v297_v29 = vld [vmem:[%s1081_s5] sm:$0xf]  ;;  %v731_v30 = vld [vmem:[%s1080_s4 + $0x4] sm:$0xf] }
  0x19   : > { %v732_v33 = vld [vmem:[%s1081_s5 + $0x4] sm:$0xf]  ;;  %v298_v36 = vld [vmem:[%s1082_s6] sm:$0xf]  ;;  %v635_v52 = vunpack.c.0.s8 %v634_v50  ;;  %s721_s15 = sshll.u32 %s269_s14, 3  ;;  %s644_s22 = scalar_lea.sflag [#allocation3], %s269_s14 }
  0x1a   : > { %v283_v3 = vsel %vm281_vm0, %v279_v1, 0.0  ;;  %v289_v5 = vsel %vm281_vm0, %v279_v1, -inf  ;;  %v733_v38 = vld [vmem:[%s1082_s6 + $0x4] sm:$0xf]  ;;  %s271_s17 = scalar_lea.vmem [#allocation2], %s721_s15 }
  0x1b   : > { %v284_v6 = vadd.f32 %v283_v3, %v282_v2  ;;  %v290_v7 = vmax.f32 %v288_v4, %v289_v5  ;;  %v638_v54 = vsub.s32 %v635_v52, %v637_v53  ;;  %s658_s18 = sshll.u32 %s271_s17, 4  ;;  %s659_s18 = int_to_ptr.vmem [resolvable:$true] %s658_s18 }
  0x1c   : > { %s823_s23 = scalar_lea.vmem %s659_s18, 128  ;;  %p830_p0 = scmp.lt.s32.totalorder %s659_s18, %s828_s8 }
  0x1d   : > { %285 = vadd.xlane.f32.xlu0 %v284_v6  ;;  %p824_p11 = scmp.ne.s32.totalorder %s659_s18, %s823_s23  ;;  %p831_p1 = scmp.lt.s32.totalorder %s829_s28, %s823_s23 }
  0x1f   : > { %p825_p12 = pnand %p824_p11, %p968_p5  ;;  %p832_p2 = por %p831_p1, %p830_p0 }
  0x21   : > { %291 = vmax.xlane.f32.xlu0 %v290_v7  ;;  %p826_p13 = pneg %p825_p12 }
  0x23   : > { %p833_p3 = pnand %p832_p2, %p826_p13 }
  0xa6   : > { %v286_v9 = vpop.xlane.xlu0 %285 }
  0xa7   : > { %v287_v10 = vmul.f32 0.00390625, %v286_v9 }
  0xa9   : > { %754 = vmatpush3.msk.msra.mxu0 %vm281_vm0, %v287_v10 }
  0xaa   : > { %756 = vmatmul.mubr.msk.f32.vlgmr.msra.gmra.mxu0 %vm299_vm2, %v293_v11  ;;  %763 = vmatprep.subr.mxu0 %v885_v8  ;;  %v292_v12 = vpop.xlane.xlu0 %291 }
  0xab   : > { %764 = vmatpush3.msk.msra.mxu0 %vm281_vm0, %v292_v12  ;;  %765 = vmatprep.mubr.msk.f32.mxu0 %vm886_vm1, %v885_v8 }
  0xae   : > { %766 = vmatmul.mubr.msk.f32.vlgmr.msra.gmra.mxu0 %vm299_vm2, %v728_v13 }
 0x16a   : > { %v372_v15 = vpop.f32.mrf.mxu0 }
 0x16b   : > { %v373_v16 = vadd.f32 %v372_v15, %v294_v14 }
 0x16c   : > { %v757_v18 = vpop.f32.mrf.mxu0 }
 0x16d   : > { %v376_v20 = vmax.f32 %v373_v16, 0.0 }
 0x16e   : > { %v539_v21 = vpop.f32.mrf.mxu0 }
 0x16f   : > { %v377_v23 = vmul.f32 %v376_v20, %v295_v17  ;;  %v540_v24 = vadd.f32 %v729_v19, %v539_v21 }
 0x170   : > { %v767_v26 = vpop.f32.mrf.mxu0 }
 0x171   : > { %v543_v27 = vmax.f32 %v540_v24, 0.0  ;;  %v378_v28 = vadd.f32 %v377_v23, %v296_v22 }
 0x173   : > { %v544_v31 = vmul.f32 %v730_v25, %v543_v27  ;;  %759 = vmatpush3.msk.msra.mxu1 %vm281_vm0, %v378_v28 }
 0x174   : > { %761 = vmatmul.mubr.msk.f32.vlgmr.msra.gmra.mxu1 %vm299_vm2, %v297_v29  ;;  %768 = vmatprep.subr.mxu1 %v885_v8 }
 0x175   : > { %v545_v32 = vadd.f32 %v731_v30, %v544_v31  ;;  %770 = vmatprep.mubr.msk.f32.mxu1 %vm886_vm1, %v885_v8 }
 0x177   : > { %769 = vmatpush3.msk.msra.mxu1 %vm281_vm0, %v545_v32 }
 0x178   : > { %771 = vmatmul.mubr.msk.f32.vlgmr.msra.gmra.mxu1 %vm299_vm2, %v732_v33 }
 0x234   : > { %v451_v35 = vpop.f32.mrf.mxu1 }
 0x235   : > { %v452_v40 = vadd.f32 %v451_v35, %v298_v36 }
 0x236   : > { %v762_v37 = vpop.f32.mrf.mxu1 }
 0x238   : > { %v618_v39 = vpop.f32.mrf.mxu1 }
 0x239   : > { %v619_v41 = vadd.f32 %v733_v38, %v618_v39 }
 0x23a   : > { %v772_v42 = vpop.f32.mrf.mxu1 }
 0x23b   : > { %v622_v43 = vadd.f32 %v619_v41, %v452_v40 }
 0x23d   : > { %v623_v44 = vsub.f32 0.0, %v622_v43 }
 0x23f   : > { %v624_v45 = vmul.f32 1.442695, %v623_v44 }
 0x241   : > { %819 = vpow2.f32 %v624_v45 }
 0x24e   : > { %v820_v46 = vpop.eup %819 }
 0x24f   : > { %v626_v47 = vadd.f32 1.0, %v820_v46 }
 0x251   : > { %821 = vrcp.f32 %v626_v47 }
 0x25e   : > { %v822_v48 = vpop.eup %821 }
 0x25f   : > { %631 = vperm.xlu1 %816, %v822_v48  }
 0x2da   : > { %v632_v55 = vpop.permute.xlu1 %631 }
 0x2db   : > { %v639_v56 = vrot.slane %v632_v55, %v638_v54 }
 0x2dd   : > { %v641_v57 = vmul.f32 %v639_v56, %v983_v0 }
 0x2df   : > { %642 = vst [vmem:[%s271_s17] sm:$0xff] %v641_v57 }
 0x2e0   : > { %836 = shalt.err (!%p833_p3)
}
 0x2e1   : > { %s837_s9 = scalar_lea.hbm %s656_s21, 128  ;;  %s841_s15 = scalar_lea.hbm %s1083_s7, 256 }
 0x2e2   : > { %p838_p4 = scmp.ne.s32.totalorder %s656_s21, %s837_s9  ;;  %p842_p9 = scmp.lt.s32.totalorder %s656_s21, %s1083_s7 }
 0x2e3   : > { %p843_p10 = scmp.lt.s32.totalorder %s841_s15, %s837_s9 }
 0x2e4   : > { %p839_p7 = pnand %p838_p4, %p968_p5 }
 0x2e5   : > { %p844_p11 = por %p843_p10, %p842_p9 }
 0x2e6   : > { %p840_p8 = pneg %p839_p7 }
 0x2e8   : > { %p845_p12 = pnand %p844_p11, %p840_p8 }
 0x2ea   : > { %848 = shalt.err (!%p845_p12)
}
 0x2eb   : > { %773 = dma.vmem_to_hbm [thread:$0]  (%p968_p5), %s659_s18, 128, %s656_s21, %s644_s22  }
 0x2ec PF: > { %p779_p13 = scmp.ge.s32.totalorder %s883_s27, 2  ;;  %s670_s19 = sand.u32 1, %s871_s24  }
 0x2ed   : > { %s671_s20 = scalar_lea.sflag [#allocation3], %s670_s19 }
 0x2ee   : > { %p776_p0 = pnand %p779_p13, %p972_p6 }
 0x2f0   : > { %p777_p1 = pneg %p776_p0 }
 0x2f2   : > { %866 = dma.done.wait (%p777_p1), %s671_s20, 128  }
 0x2f3   : > { %868 = vsyncadd (%p777_p1), %s671_s20, 4294967168  ;;  %p17_p2 = scmp.ge.s32.totalorder %s955_s30, 4   ;;  %s1086_s24 = smov %s875_s25 }
 0x2f4   : > { %s1087_s25 = smov %s879_s26  ;;  %s1088_s26 = smov %s966_s10 }
 0x2f5   : > { %s1089_s27 = smov %s955_s30  ;;  %19 = sbr.rel (!%p17_p2) target bundleno = 3 (0x3), region = 89 }
 0x2fa   :  { %676 = vsyncpa [#allocation3], 1 }
 0x2fb   :  { %678 = vsyncpa [#allocation3 + $0x1], 1 }

</bundles_post_ra>
